<compile_context>
chip_gen: v5e
topology: v5e:2x2
jax: 0.10.0
libtpu: 0.0.40
codegen_flags: <defaults>
</compile_context>

<pallas_src>
import functools

import jax
import jax.numpy as jnp
from jax.experimental import pallas as pl
from jax.experimental.pallas import tpu as pltpu

LANE = 128  # vreg lane width (last dim)


def _round_up(n: int, m: int) -> int:
    return ((n + m - 1) // m) * m


def _sublane(dtype) -> int:
    # fp32 packs 8 rows per vreg sublane group; bf16 packs 16.
    return 16 if jnp.dtype(dtype) == jnp.dtype(jnp.bfloat16) else 8


def mlp_kernel(x_ref, w1_ref, b1_ref, w2_ref, b2_ref, w3_ref, b3_ref, out_ref):
    """One batch tile through all three layers; fp32 accumulation on the MXU."""
    x = x_ref[...]

    # Layer 1 + ReLU  (bias is a (1, N) row; jnp broadcasting)
    h1 = jnp.dot(x, w1_ref[...], preferred_element_type=jnp.float32) + b1_ref[...]
    h1 = jnp.maximum(h1, 0.0)

    # Layer 2 + ReLU
    h2 = jnp.dot(h1.astype(w2_ref.dtype), w2_ref[...],
                 preferred_element_type=jnp.float32) + b2_ref[...]
    h2 = jnp.maximum(h2, 0.0)

    # Layer 3 (logits, no activation)
    out = jnp.dot(h2.astype(w3_ref.dtype), w3_ref[...],
                  preferred_element_type=jnp.float32) + b3_ref[...]
    out_ref[...] = out.astype(out_ref.dtype)


def prepare_params(params, compute_dtype=jnp.float32):
    """One-time parameter prep: cast weights and lane-pad the hidden dim to 128.

    Zero-padding the hidden dim is exact: padded hidden units are relu(0+0)=0
    and the corresponding zero rows of the next weight contribute nothing.
    Input (K) and output (C) dims are kept at their natural sizes.
    """
    w1, b1 = params["w1"], params["b1"]
    w2, b2 = params["w2"], params["b2"]
    w3, b3 = params["w3"], params["b3"]
    K, H = w1.shape
    C = w3.shape[1]
    Hp = _round_up(H, LANE)

    w1p = jnp.zeros((K, Hp), compute_dtype).at[:, :H].set(w1.astype(compute_dtype))
    w2p = jnp.zeros((Hp, Hp), compute_dtype).at[:H, :H].set(w2.astype(compute_dtype))
    w3p = jnp.zeros((Hp, C), compute_dtype).at[:H, :].set(w3.astype(compute_dtype))
    # Biases stay fp32 (added to the fp32 accumulator).
    b1p = jnp.zeros((1, Hp), jnp.float32).at[:, :H].set(b1.reshape(1, H))
    b2p = jnp.zeros((1, Hp), jnp.float32).at[:, :H].set(b2.reshape(1, H))
    b3p = b3.astype(jnp.float32).reshape(1, C)
    return {"w1": w1p, "b1": b1p, "w2": w2p, "b2": b2p, "w3": w3p, "b3": b3p}


@functools.partial(jax.jit, static_argnames=("batch_tile", "compute_dtype"))
def neural_net_forward(x, prepared, *, batch_tile: int = 2048,
                       compute_dtype=jnp.float32):
    """x: (B, input_size). prepared: output of prepare_params(). Returns (B, C) fp32."""
    w1, b1 = prepared["w1"], prepared["b1"]
    w2, b2 = prepared["w2"], prepared["b2"]
    w3, b3 = prepared["w3"], prepared["b3"]

    B, K = x.shape
    C = w3.shape[1]

    sub = _sublane(compute_dtype)
    # Batch tile: big (roofline), sublane-aligned, no padding to a tb multiple.
    tb = _round_up(min(batch_tile, _round_up(B, sub)), sub)
    # Keep >= 2 grid steps when the batch allows it so both v7x TensorCores get
    # work under dimension_semantics=("parallel",).
    if B > sub and pl.cdiv(B, tb) < 2:
        tb = _round_up(pl.cdiv(B, 2), sub)
    grid = (pl.cdiv(B, tb),)

    x = x.astype(compute_dtype)

    # Weights/biases: constant block index -> DMA'd once, resident across tiles.
    def resident(a):
        return pl.BlockSpec(a.shape, lambda i, _nd=a.ndim: (0,) * _nd)

    return pl.pallas_call(
        mlp_kernel,
        out_shape=jax.ShapeDtypeStruct((B, C), jnp.float32),
        grid=grid,
        in_specs=[
            pl.BlockSpec((tb, K), lambda i: (i, 0)),   # x streams over batch tiles
            resident(w1), resident(b1),
            resident(w2), resident(b2),
            resident(w3), resident(b3),
        ],
        out_specs=pl.BlockSpec((tb, C), lambda i: (i, 0)),
        compiler_params=pltpu.CompilerParams(dimension_semantics=("parallel",)),
    )(x, w1, b1, w2, b2, w3, b3)


def init_params(key, input_size, hidden_size, num_classes):
    """Deterministic init (uniform like PyTorch's default Linear init)."""
    ks = jax.random.split(key, 6)

    def linear(kw, kb, fan_in, fan_out):
        bound = 1.0 / jnp.sqrt(fan_in)
        # stored as (in, out) so the kernel does x @ W
        w = jax.random.uniform(kw, (fan_in, fan_out), jnp.float32, -bound, bound)
        b = jax.random.uniform(kb, (1, fan_out), jnp.float32, -bound, bound)
        return w, b

    w1, b1 = linear(ks[0], ks[1], input_size, hidden_size)
    w2, b2 = linear(ks[2], ks[3], hidden_size, hidden_size)
    w3, b3 = linear(ks[4], ks[5], hidden_size, num_classes)
    return {"w1": w1, "b1": b1, "w2": w2, "b2": b2, "w3": w3, "b3": b3}


def _reference(x, params):
    h1 = jnp.maximum(x @ params["w1"] + params["b1"], 0.0)
    h2 = jnp.maximum(h1 @ params["w2"] + params["b2"], 0.0)
    return h2 @ params["w3"] + params["b3"]


if __name__ == "__main__":
    # Small shapes consistent with the module: bag-of-words input -> hidden=8 -> classes.
    input_size = 16
    hidden_size = 8
    num_classes = 5

    key = jax.random.PRNGKey(0)
    k_x1, k_x2, k_p = jax.random.split(key, 3)
    params = init_params(k_p, input_size, hidden_size, num_classes)

    # One-time parameter prep (fp32 path; do once, reuse across forwards).
    prepared_f32 = prepare_params(params, jnp.float32)

    # Case 1: tiny batch (single grid step).
    x_small = jax.random.normal(k_x1, (8, input_size), dtype=jnp.float32)
    out_small = jax.block_until_ready(neural_net_forward(x_small, prepared_f32))
    ref_small = _reference(x_small, params)
    assert out_small.shape == (8, num_classes)
    assert jnp.allclose(out_small, ref_small, atol=1e-5, rtol=1e-5)

    # Case 2: larger, non-multiple-of-8 batch -> 2 grid steps with a partial last tile.
    x_big = jax.random.normal(k_x2, (300, input_size), dtype=jnp.float32)
    out_big = jax.block_until_ready(neural_net_forward(x_big, prepared_f32))
    ref_big = _reference(x_big, params)
    assert out_big.shape == (300, num_classes)
    assert jnp.allclose(out_big, ref_big, atol=1e-5, rtol=1e-5)

    # Case 3: bf16 compute path (recommended default on v6e/v7x); loose tolerance.
    prepared_bf16 = prepare_params(params, jnp.bfloat16)
    out_bf16 = jax.block_until_ready(
        neural_net_forward(x_big, prepared_bf16, compute_dtype=jnp.bfloat16))
    assert out_bf16.shape == (300, num_classes)
    assert bool(jnp.all(jnp.isfinite(out_bf16)))
    assert jnp.allclose(out_bf16, ref_big, atol=5e-2, rtol=5e-2)

    print("KERNEL_OK")
</pallas_src>

<mosaic_0001>
module attributes {stable_mosaic.version = 11 : i64} {
  func.func @mlp_kernel(%arg0: i32, %arg1: memref<8x16xf32, #tpu.memory_space<vmem>>, %arg2: memref<16x128xf32, #tpu.memory_space<vmem>>, %arg3: memref<1x128xf32, #tpu.memory_space<vmem>>, %arg4: memref<128x128xf32, #tpu.memory_space<vmem>>, %arg5: memref<1x128xf32, #tpu.memory_space<vmem>>, %arg6: memref<128x5xf32, #tpu.memory_space<vmem>>, %arg7: memref<1x5xf32, #tpu.memory_space<vmem>>, %arg8: memref<8x5xf32, #tpu.memory_space<vmem>>) attributes {dimension_semantics = [#tpu.dimension_semantics<parallel>], iteration_bounds = array<i64: 1>, scalar_prefetch = 0 : i64, scratch_operands = 0 : i64, tpu.core_type = #tpu.core_type<tc>, window_params = [{transform_indices = @transform_0, window_bounds = array<i64: 8, 16>}, {pipeline_mode = #tpu.pipeline_mode<synchronous>, transform_indices = @transform_1, window_bounds = array<i64: 16, 128>}, {pipeline_mode = #tpu.pipeline_mode<synchronous>, transform_indices = @transform_2, window_bounds = array<i64: 1, 128>}, {pipeline_mode = #tpu.pipeline_mode<synchronous>, transform_indices = @transform_3, window_bounds = array<i64: 128, 128>}, {pipeline_mode = #tpu.pipeline_mode<synchronous>, transform_indices = @transform_4, window_bounds = array<i64: 1, 128>}, {pipeline_mode = #tpu.pipeline_mode<synchronous>, transform_indices = @transform_5, window_bounds = array<i64: 128, 5>}, {pipeline_mode = #tpu.pipeline_mode<synchronous>, transform_indices = @transform_6, window_bounds = array<i64: 1, 5>}, {transform_indices = @transform_7, window_bounds = array<i64: 8, 5>}]} {
    %c0 = arith.constant 0 : index
    %c0_0 = arith.constant 0 : index
    %0 = vector.load %arg1[%c0, %c0_0] : memref<8x16xf32, #tpu.memory_space<vmem>>, vector<8x16xf32>
    %c0_1 = arith.constant 0 : index
    %c0_2 = arith.constant 0 : index
    %1 = vector.load %arg2[%c0_1, %c0_2] : memref<16x128xf32, #tpu.memory_space<vmem>>, vector<16x128xf32>
    %cst = arith.constant dense<0.000000e+00> : vector<8x128xf32>
    %2 = tpu.matmul %0, %1, %cst {dimension_numbers = #tpu.dot_dimension_numbers<[1], [0], [0], [1], [0, 0, 1, 1], [], []>} : vector<8x16xf32>, vector<16x128xf32>, vector<8x128xf32> -> vector<8x128xf32>
    %c0_3 = arith.constant 0 : index
    %c0_4 = arith.constant 0 : index
    %3 = vector.load %arg3[%c0_3, %c0_4] : memref<1x128xf32, #tpu.memory_space<vmem>>, vector<1x128xf32>
    %4 = vector.broadcast %3 : vector<1x128xf32> to vector<8x128xf32>
    %5 = arith.addf %2, %4 : vector<8x128xf32>
    %cst_5 = arith.constant 0.000000e+00 : f32
    %6 = vector.broadcast %cst_5 : f32 to vector<8x128xf32>
    %7 = arith.maximumf %5, %6 : vector<8x128xf32>
    %c0_6 = arith.constant 0 : index
    %c0_7 = arith.constant 0 : index
    %8 = vector.load %arg4[%c0_6, %c0_7] : memref<128x128xf32, #tpu.memory_space<vmem>>, vector<128x128xf32>
    %cst_8 = arith.constant dense<0.000000e+00> : vector<8x128xf32>
    %9 = tpu.matmul %7, %8, %cst_8 {dimension_numbers = #tpu.dot_dimension_numbers<[1], [0], [0], [1], [0, 0, 1, 1], [], []>} : vector<8x128xf32>, vector<128x128xf32>, vector<8x128xf32> -> vector<8x128xf32>
    %c0_9 = arith.constant 0 : index
    %c0_10 = arith.constant 0 : index
    %10 = vector.load %arg5[%c0_9, %c0_10] : memref<1x128xf32, #tpu.memory_space<vmem>>, vector<1x128xf32>
    %11 = vector.broadcast %10 : vector<1x128xf32> to vector<8x128xf32>
    %12 = arith.addf %9, %11 : vector<8x128xf32>
    %cst_11 = arith.constant 0.000000e+00 : f32
    %13 = vector.broadcast %cst_11 : f32 to vector<8x128xf32>
    %14 = arith.maximumf %12, %13 : vector<8x128xf32>
    %c0_12 = arith.constant 0 : index
    %c0_13 = arith.constant 0 : index
    %15 = vector.load %arg6[%c0_12, %c0_13] : memref<128x5xf32, #tpu.memory_space<vmem>>, vector<128x5xf32>
    %cst_14 = arith.constant dense<0.000000e+00> : vector<8x5xf32>
    %16 = tpu.matmul %14, %15, %cst_14 {dimension_numbers = #tpu.dot_dimension_numbers<[1], [0], [0], [1], [0, 0, 1, 1], [], []>} : vector<8x128xf32>, vector<128x5xf32>, vector<8x5xf32> -> vector<8x5xf32>
    %c0_15 = arith.constant 0 : index
    %c0_16 = arith.constant 0 : index
    %17 = vector.load %arg7[%c0_15, %c0_16] : memref<1x5xf32, #tpu.memory_space<vmem>>, vector<1x5xf32>
    %18 = vector.broadcast %17 : vector<1x5xf32> to vector<8x5xf32>
    %19 = arith.addf %16, %18 : vector<8x5xf32>
    %c0_17 = arith.constant 0 : index
    %c0_18 = arith.constant 0 : index
    %20 = vector.load %arg8[%c0_17, %c0_18] : memref<8x5xf32, #tpu.memory_space<vmem>>, vector<8x5xf32>
    tpu.vector_store %arg8[%c0_17, %c0_18], %19 {strides = array<i32>} : memref<8x5xf32, #tpu.memory_space<vmem>>, vector<8x5xf32>,
    return
  }
  func.func @transform_0(%arg0: i32) -> (i32, i32) {
    %c0_i32 = arith.constant 0 : i32
    %c0_i32_0 = arith.constant 0 : i32
    return %arg0, %c0_i32 : i32, i32
  }
  func.func @transform_1(%arg0: i32) -> (i32, i32) {
    %c0_i32 = arith.constant 0 : i32
    %c0_i32_0 = arith.constant 0 : i32
    %c0_i32_1 = arith.constant 0 : i32
    return %c0_i32, %c0_i32_0 : i32, i32
  }
  func.func @transform_2(%arg0: i32) -> (i32, i32) {
    %c0_i32 = arith.constant 0 : i32
    %c0_i32_0 = arith.constant 0 : i32
    %c0_i32_1 = arith.constant 0 : i32
    return %c0_i32, %c0_i32_0 : i32, i32
  }
  func.func @transform_3(%arg0: i32) -> (i32, i32) {
    %c0_i32 = arith.constant 0 : i32
    %c0_i32_0 = arith.constant 0 : i32
    %c0_i32_1 = arith.constant 0 : i32
    return %c0_i32, %c0_i32_0 : i32, i32
  }
  func.func @transform_4(%arg0: i32) -> (i32, i32) {
    %c0_i32 = arith.constant 0 : i32
    %c0_i32_0 = arith.constant 0 : i32
    %c0_i32_1 = arith.constant 0 : i32
    return %c0_i32, %c0_i32_0 : i32, i32
  }
  func.func @transform_5(%arg0: i32) -> (i32, i32) {
    %c0_i32 = arith.constant 0 : i32
    %c0_i32_0 = arith.constant 0 : i32
    %c0_i32_1 = arith.constant 0 : i32
    return %c0_i32, %c0_i32_0 : i32, i32
  }
  func.func @transform_6(%arg0: i32) -> (i32, i32) {
    %c0_i32 = arith.constant 0 : i32
    %c0_i32_0 = arith.constant 0 : i32
    %c0_i32_1 = arith.constant 0 : i32
    return %c0_i32, %c0_i32_0 : i32, i32
  }
  func.func @transform_7(%arg0: i32) -> (i32, i32) {
    %c0_i32 = arith.constant 0 : i32
    %c0_i32_0 = arith.constant 0 : i32
    return %arg0, %c0_i32 : i32, i32
  }
}

</mosaic_0001>

<bundles_post_ra>
// kernel: neural_net_forward.1
= control target key start
LH: loop header
LB: loop body
LE: loop exit
PB: predicated region body
PF: predicated region fallthrough
CT: control target
= control target key end

     0   :  { %12 = vsyncpa [#allocation3], 0  ;;  %s393_s0 = inlined_call_operand.vmem [shape: f32[8,16], index: 0, kind: input, shape index: {}]   ;;  %s394_s1 = inlined_call_operand.hbm [shape: f32[16,128], index: 1, kind: input, shape index: {}]   ;;  %s395_s2 = inlined_call_operand.vmem [shape: f32[1,128], index: 2, kind: input, shape index: {}]   ;;  %s396_s3 = inlined_call_operand.vmem [shape: f32[128,128], index: 3, kind: input, shape index: {}]   ;;  %s397_s4 = inlined_call_operand.vmem [shape: f32[1,128], index: 4, kind: input, shape index: {}]   ;;  %s398_s5 = inlined_call_operand.vmem [shape: f32[128,5], index: 5, kind: input, shape index: {}]   ;;  %s399_s6 = inlined_call_operand.vmem [shape: f32[1,5], index: 6, kind: input, shape index: {}]   ;;  %s400_s7 = inlined_call_operand.hbm [shape: f32[8,5], index: 7, kind: output, shape index: {}]  }
   0x1   :  { %13 = vsyncpa [#allocation4], 0  ;;  %s20_s26 = sshll.u32 %s394_s1, 4  ;;  %s235_s27 = smov [#allocation2]   ;;  %s21_s26 = int_to_ptr.hbm [resolvable:$true] %s20_s26 }
   0x2   :  { %s22_s28 = sshll.u32 %s235_s27, 4  ;;  %s236_s29 = smov 128   ;;  %s23_s28 = int_to_ptr.vmem [resolvable:$true] %s22_s28 }
   0x3   :  { %s237_s30 = smov 8  }
   0x4   :  { %28 = dma.hbm_to_vmem [thread:$0]  %s21_s26, 256, %s23_s28, [#allocation3], %s236_s29, %s236_s29, %s237_s30  }
   0x5   :  { %231 = dma.done.wait [#allocation3], 256  }
   0x6   :  { %232 = vsyncadd [#allocation3], 4294967040  ;;  %v45_v0 = vld [vmem:[#allocation2 + $0x8] sm:$0xff]  ;;  %v44_v1 = vld [vmem:[#allocation2] sm:$0xff]  ;;  %vm50_vm0 = vcmask 130048   ;;  %s238_s25 = smov [#allocation5]  }
   0x7   :  { %68 = vmatpush.msra.mxu0 %v45_v0  ;;  %v43_v2 = vld [vmem:[%s393_s0] sm:$0xff]  ;;  %v90_v3 = vld [vmem:[%s396_s3 + $0x78] sm:$0xff]  ;;  %v89_v4 = vld [vmem:[%s396_s3 + $0x70] sm:$0xff]  ;;  %s163_s26 = sshll.u32 %s238_s25, 4  ;;  %s165_s29 = sshll.u32 %s400_s7, 4  ;;  %vm156_vm1 = vcmask 39936   ;;  %s164_s26 = int_to_ptr.vmem [resolvable:$true] %s163_s26  ;;  %s166_s29 = int_to_ptr.hbm [resolvable:$true] %s165_s29 }
   0x8   :  { %95 = vmatpush.msra.mxu1 %v90_v3  ;;  %v88_v5 = vld [vmem:[%s396_s3 + $0x68] sm:$0xff]  ;;  %v87_v6 = vld [vmem:[%s396_s3 + $0x60] sm:$0xff]  ;;  %v86_v7 = vld [vmem:[%s396_s3 + $0x58] sm:$0xff] }
   0x9   :  { %69 = vmatpush.msra.mxu0 %v44_v1  ;;  %v85_v8 = vld [vmem:[%s396_s3 + $0x50] sm:$0xff]  ;;  %v84_v9 = vld [vmem:[%s396_s3 + $0x48] sm:$0xff]  ;;  %v83_v10 = vld [vmem:[%s396_s3 + $0x40] sm:$0xff] }
   0xa   :  { %175 = vmatmul.msk.f32.vlgmr.msra.gmra.mxu0 %vm50_vm0, %v43_v2  ;;  %96 = vmatpush.msra.mxu1 %v89_v4  ;;  %v82_v11 = vld [vmem:[%s396_s3 + $0x38] sm:$0xff]  ;;  %v81_v12 = vld [vmem:[%s396_s3 + $0x30] sm:$0xff]  ;;  %v80_v13 = vld [vmem:[%s396_s3 + $0x28] sm:$0xff] }
   0xb   :  { %v79_v14 = vld [vmem:[%s396_s3 + $0x20] sm:$0xff]  ;;  %v78_v15 = vld [vmem:[%s396_s3 + $0x18] sm:$0xff]  ;;  %v77_v16 = vld [vmem:[%s396_s3 + $0x10] sm:$0xff] }
   0xc   :  { %97 = vmatpush.msra.mxu1 %v88_v5  ;;  %v76_v17 = vld [vmem:[%s396_s3 + $0x8] sm:$0xff]  ;;  %v75_v18 = vld [vmem:[%s396_s3] sm:$0xff]  ;;  %v131_v19 = vld [vmem:[%s398_s5 + $0x78] sm:$0xff] }
   0xd   :  { %v130_v20 = vld [vmem:[%s398_s5 + $0x70] sm:$0xff]  ;;  %136 = vmatpush.msra.mxu2 %v131_v19  ;;  %v129_v21 = vld [vmem:[%s398_s5 + $0x68] sm:$0xff]  ;;  %v128_v22 = vld [vmem:[%s398_s5 + $0x60] sm:$0xff] }
   0xe   :  { %98 = vmatpush.msra.mxu1 %v87_v6  ;;  %v127_v23 = vld [vmem:[%s398_s5 + $0x58] sm:$0xff]  ;;  %v126_v24 = vld [vmem:[%s398_s5 + $0x50] sm:$0xff]  ;;  %v125_v25 = vld [vmem:[%s398_s5 + $0x48] sm:$0xff] }
   0xf   :  { %137 = vmatpush.msra.mxu2 %v130_v20  ;;  %v124_v26 = vld [vmem:[%s398_s5 + $0x40] sm:$0xff]  ;;  %v123_v27 = vld [vmem:[%s398_s5 + $0x38] sm:$0xff]  ;;  %v122_v28 = vld [vmem:[%s398_s5 + $0x30] sm:$0xff] }
  0x10   :  { %99 = vmatpush.msra.mxu1 %v86_v7  ;;  %v121_v29 = vld [vmem:[%s398_s5 + $0x28] sm:$0xff]  ;;  %v120_v30 = vld [vmem:[%s398_s5 + $0x20] sm:$0xff]  ;;  %v119_v31 = vld [vmem:[%s398_s5 + $0x18] sm:$0xff] }
  0x11   :  { %138 = vmatpush.msra.mxu2 %v129_v21  ;;  %v180_v32 = vld [vmem:[%s395_s2] ss:$0 sm:$0xff]  ;;  %v118_v36 = vld [vmem:[%s398_s5 + $0x10] sm:$0xff]  ;;  %v117_v37 = vld [vmem:[%s398_s5 + $0x8] sm:$0xff] }
  0x12   :  { %100 = vmatpush.msra.mxu1 %v85_v8  ;;  %v116_v38 = vld [vmem:[%s398_s5] sm:$0xff] }
  0x13   :  { %139 = vmatpush.msra.mxu2 %v128_v22  ;;  %v181_v39 = vld [vmem:[%s397_s4] ss:$0 sm:$0xff] }
  0x14   :  { %101 = vmatpush.msra.mxu1 %v84_v9  ;;  %v182_v43 = vld [vmem:[%s399_s6] ss:$0 sm:$0xff] }
  0x15   :  { %140 = vmatpush.msra.mxu2 %v127_v23 }
  0x16   :  { %102 = vmatpush.msra.mxu1 %v83_v10 }
  0x17   :  { %141 = vmatpush.msra.mxu2 %v126_v24 }
  0x18   :  { %103 = vmatpush.msra.mxu1 %v82_v11 }
  0x19   :  { %142 = vmatpush.msra.mxu2 %v125_v25 }
  0x1a   :  { %104 = vmatpush.msra.mxu1 %v81_v12 }
  0x1b   :  { %143 = vmatpush.msra.mxu2 %v124_v26 }
  0x1c   :  { %105 = vmatpush.msra.mxu1 %v80_v13 }
  0x1d   :  { %144 = vmatpush.msra.mxu2 %v123_v27 }
  0x1e   :  { %106 = vmatpush.msra.mxu1 %v79_v14 }
  0x1f   :  { %145 = vmatpush.msra.mxu2 %v122_v28 }
  0x20   :  { %107 = vmatpush.msra.mxu1 %v78_v15 }
  0x21   :  { %146 = vmatpush.msra.mxu2 %v121_v29 }
  0x22   :  { %108 = vmatpush.msra.mxu1 %v77_v16 }
  0x23   :  { %147 = vmatpush.msra.mxu2 %v120_v30 }
  0x24   :  { %109 = vmatpush.msra.mxu1 %v76_v17 }
  0x25   :  { %148 = vmatpush.msra.mxu2 %v119_v31 }
  0x26   :  { %110 = vmatpush.msra.mxu1 %v75_v18 }
  0x27   :  { %149 = vmatpush.msra.mxu2 %v118_v36 }
  0x29   :  { %150 = vmatpush.msra.mxu2 %v117_v37 }
  0x2b   :  { %151 = vmatpush.msra.mxu2 %v116_v38 }
  0x87   :  { %v71_v33 = vpop.f32.mrf.mxu0 }
  0x88   :  { %v72_v34 = vadd.f32 %v180_v32, %v71_v33 }
  0x8a   :  { %v74_v35 = vmax.f32 %v72_v34, 0.0 }
  0x8c   :  { %111 = vmatmul.f32.vlgmr.msra.gmra.mxu1 %v74_v35 }
 0x109   :  { %v112_v40 = vpop.f32.mrf.mxu1 }
 0x10a   :  { %v113_v41 = vadd.f32 %v181_v39, %v112_v40 }
 0x10c   :  { %v115_v42 = vmax.f32 %v113_v41, 0.0 }
 0x10e   :  { %152 = vmatmul.f32.vlgmr.msra.gmra.mxu2 %v115_v42 }
 0x191   :  { %v153_v44 = vpop.f32.mrf.mxu2 }
 0x192   :  { %v154_v45 = vadd.f32 %v182_v43, %v153_v44 }
 0x194   :  { %157 = vst.msk [vmem:[#allocation5] sm:$0xff] %vm156_vm1, %v154_v45 }
 0x195   :  { %168 = dma.vmem_to_hbm [thread:$0]  %s164_s26, 128, %s166_s29, [#allocation4]  }
 0x196   :  { %233 = dma.done.wait [#allocation4], 128  }
 0x197   :  { %234 = vsyncadd [#allocation4], 4294967168 }
 0x198   :  { %173 = vsyncpa [#allocation3], 1 }
 0x199   :  { %174 = vsyncpa [#allocation4], 1 }

</bundles_post_ra>
